<compile_context>
chip_gen: v7x
topology: tpu7x:2x2x1
jax: 0.10.0
libtpu: 0.0.40
codegen_flags: <defaults>
</compile_context>

<pallas_src>
import functools
import math

import jax
import jax.numpy as jnp
from jax.experimental import pallas as pl
from jax.experimental.pallas import tpu as pltpu


def _mhla_head_kernel(x_ref, wq_ref, wkv_ref, wuk_ref, wuv_ref, wo_ref,
                      out_ref, latent_ref, *, lambda_decay, seq):
    """One (batch b, head h) grid step.

    Block shapes seen by the kernel (leading grid dims squeezed):
      x_ref:      (S, D)   bf16   batch row b
      wq_ref:     (D, hd)  bf16   head-h column block of W_q^T (1/sqrt(D) folded in)
      wkv_ref:    (D, L)   bf16   fused [W_down_kv (W_k + W_v)]^T (same block each step)
      wuk_ref:    (L, hd)  bf16   head-h column block of W_up_k^T
      wuv_ref:    (L, hd)  bf16   head-h column block of W_up_v^T
      wo_ref:     (hd, D)  bf16   head-h row block of W_o^T
      out_ref:    (S, D)   f32    resident accumulator across the head axis
      latent_ref: (S, L)   bf16   scratch; shared latent, computed once per batch row
    """
    h = pl.program_id(1)
    x = x_ref[...]

    @pl.when(h == 0)
    def _():
        # Fused K/V/down projection, computed once per batch row and reused by all
        # heads of this row.  Also zero the resident output accumulator.
        lat = jnp.dot(x, wkv_ref[...], preferred_element_type=jnp.float32)
        latent_ref[...] = lat.astype(jnp.bfloat16)
        out_ref[...] = jnp.zeros_like(out_ref)

    lat = latent_ref[...]                                                 # (S, L) bf16

    # Per-head projections: lane-dense (., hd) slabs straight from BlockSpec — no
    # in-kernel lane slicing, reshapes, or transposes.
    q = jnp.dot(x, wq_ref[...], preferred_element_type=jnp.float32)      # (S, hd)
    k = jnp.dot(lat, wuk_ref[...], preferred_element_type=jnp.float32)   # (S, hd)
    v = jnp.dot(lat, wuv_ref[...], preferred_element_type=jnp.float32)   # (S, hd)

    # scores = q k^T (score scale already folded into W_q^T).  NT dimension numbers
    # avoid materializing an explicit transpose of k.
    scores = jax.lax.dot_general(
        q.astype(jnp.bfloat16), k.astype(jnp.bfloat16),
        dimension_numbers=(((1,), (1,)), ((), ())),
        preferred_element_type=jnp.float32)                              # (S, S) f32

    # Time decay exp(-lambda |i-j|), recomputed per tile on the otherwise-idle EUP
    # instead of shipping an (S,S) f32 matrix through HBM/VMEM.
    ti = jax.lax.broadcasted_iota(jnp.int32, (seq, seq), 0)
    tj = jax.lax.broadcasted_iota(jnp.int32, (seq, seq), 1)
    decay = jnp.exp(jnp.abs(ti - tj).astype(jnp.float32) * (-lambda_decay))
    scores = scores * decay

    # Softmax over keys in f32 (denominator reciprocal on the EUP).
    m = jnp.max(scores, axis=-1, keepdims=True)
    e = jnp.exp(scores - m)
    w = e * pl.reciprocal(jnp.sum(e, axis=-1, keepdims=True), approx=True)

    ctx = jnp.dot(w.astype(jnp.bfloat16), v.astype(jnp.bfloat16),
                  preferred_element_type=jnp.float32)                    # (S, hd)

    # Output projection for this head, accumulated into the resident output block:
    #   out_b = sum_h ctx_h @ W_o^T[h*hd:(h+1)*hd, :]
    # (identical to concat(heads) @ W_o^T, without a lane-axis concat).
    out_ref[...] += jnp.dot(ctx.astype(jnp.bfloat16), wo_ref[...],
                            preferred_element_type=jnp.float32)


def prepare_mhla_params(params, *, num_heads):
    """One-time weight preparation, hoisted out of the per-call forward path.

    PyTorch-convention weights (out_features, in_features) -> transposed x @ W^T
    layout, 1/sqrt(d_model) folded into W_q, W_down_kv(W_k + W_v) fused, per-head
    column/row blocks split into head-major arrays, cast to bf16 MXU operands.
    """
    f32, bf16 = jnp.float32, jnp.bfloat16
    D = params["W_q"].shape[0]
    L = params["W_down_kv"].shape[0]
    H = num_heads
    hd = D // H

    wq_t = params["W_q"].astype(f32).T * (1.0 / math.sqrt(D))              # (D, D)
    wkv_t = (params["W_down_kv"].astype(f32)
             @ (params["W_k"].astype(f32) + params["W_v"].astype(f32))).T  # (D, L)
    wuk_t = params["W_up_k"].astype(f32).T                                 # (L, D)
    wuv_t = params["W_up_v"].astype(f32).T                                 # (L, D)
    wo_t = params["W_o"].astype(f32).T                                     # (D, D)

    return {
        "wq_heads": wq_t.reshape(D, H, hd).transpose(1, 0, 2).astype(bf16),    # (H, D, hd)
        "wkv_t": wkv_t.astype(bf16),                                           # (D, L)
        "wuk_heads": wuk_t.reshape(L, H, hd).transpose(1, 0, 2).astype(bf16),  # (H, L, hd)
        "wuv_heads": wuv_t.reshape(L, H, hd).transpose(1, 0, 2).astype(bf16),  # (H, L, hd)
        "wo_heads": wo_t.reshape(H, hd, D).astype(bf16),                       # (H, hd, D)
    }


def mhla_forward(x, prepared, *, num_heads, lambda_decay):
    """x: (B, S, D) float32. prepared: output of prepare_mhla_params."""
    B, S, D = x.shape
    H = num_heads
    hd = D // H
    L = prepared["wkv_t"].shape[1]

    x_bf = x.astype(jnp.bfloat16)
    kernel = functools.partial(_mhla_head_kernel,
                               lambda_decay=float(lambda_decay), seq=S)

    out = pl.pallas_call(
        kernel,
        out_shape=jax.ShapeDtypeStruct((B, S, D), jnp.float32),
        grid=(B, H),
        in_specs=[
            pl.BlockSpec((None, S, D), lambda b, h: (b, 0, 0)),     # x (per batch)
            pl.BlockSpec((None, D, hd), lambda b, h: (h, 0, 0)),    # W_q^T head block
            pl.BlockSpec((D, L), lambda b, h: (0, 0)),              # fused down-proj
            pl.BlockSpec((None, L, hd), lambda b, h: (h, 0, 0)),    # W_up_k^T head block
            pl.BlockSpec((None, L, hd), lambda b, h: (h, 0, 0)),    # W_up_v^T head block
            pl.BlockSpec((None, hd, D), lambda b, h: (h, 0, 0)),    # W_o^T head block
        ],
        out_specs=pl.BlockSpec((None, S, D), lambda b, h: (b, 0, 0)),
        scratch_shapes=[pltpu.VMEM((S, L), jnp.bfloat16)],          # shared latent
        compiler_params=pltpu.CompilerParams(
            # batch axis sharded across TensorCores on v7x; head axis is a resident
            # output-accumulator reduction.
            dimension_semantics=("parallel", "arbitrary"),
        ),
    )(x_bf, prepared["wq_heads"], prepared["wkv_t"],
      prepared["wuk_heads"], prepared["wuv_heads"], prepared["wo_heads"])
    return out


def mhla_reference(x, params, *, num_heads, lambda_decay):
    """Pure-JAX f32 reference mirroring the PyTorch forward, for validation."""
    B, S, D = x.shape
    hd = D // num_heads
    q = x @ params["W_q"].T
    k = x @ params["W_k"].T
    v = x @ params["W_v"].T
    latent = (k + v) @ params["W_down_kv"].T
    k_rec = latent @ params["W_up_k"].T
    v_rec = latent @ params["W_up_v"].T

    def heads(t):  # (B,S,D) -> (B,H,S,hd)
        return t.reshape(B, S, num_heads, hd).transpose(0, 2, 1, 3)

    qh, kh, vh = heads(q), heads(k_rec), heads(v_rec)
    scores = jnp.einsum("bhqd,bhkd->bhqk", qh, kh) / math.sqrt(D)
    t = jnp.arange(S, dtype=jnp.float32)
    decay = jnp.exp(-lambda_decay * jnp.abs(t[None, :] - t[:, None]))
    scores = scores * decay[None, None]
    w = jax.nn.softmax(scores, axis=-1)
    out = jnp.einsum("bhqk,bhkd->bhqd", w, vh)
    out = out.transpose(0, 2, 1, 3).reshape(B, S, D)
    return out @ params["W_o"].T


def _init_params(key, d_model, d_latent):
    """Deterministic init mimicking nn.Linear default (uniform +/- 1/sqrt(fan_in))."""
    def lin(k, out_f, in_f):
        bound = 1.0 / math.sqrt(in_f)
        return jax.random.uniform(k, (out_f, in_f), jnp.float32, -bound, bound)

    ks = jax.random.split(key, 7)
    return {
        "W_q": lin(ks[0], d_model, d_model),
        "W_k": lin(ks[1], d_model, d_model),
        "W_v": lin(ks[2], d_model, d_model),
        "W_o": lin(ks[3], d_model, d_model),
        "W_down_kv": lin(ks[4], d_latent, d_model),
        "W_up_k": lin(ks[5], d_model, d_latent),
        "W_up_v": lin(ks[6], d_model, d_latent),
    }


if __name__ == "__main__":
    # Small shapes consistent with the module: batch=2, seq=8, d_model=32, heads=4, latent=16
    B, S, D = 2, 8, 32
    NUM_HEADS = 4
    D_LATENT = 16
    LAMBDA_DECAY = 0.01

    key = jax.random.PRNGKey(0)
    kx, kp = jax.random.split(key)
    x = jax.random.normal(kx, (B, S, D), dtype=jnp.float32)
    params = _init_params(kp, D, D_LATENT)

    prepared = prepare_mhla_params(params, num_heads=NUM_HEADS)  # once, at "init"
    out = mhla_forward(x, prepared, num_heads=NUM_HEADS, lambda_decay=LAMBDA_DECAY)
    out = jax.block_until_ready(out)

    ref = mhla_reference(x, params, num_heads=NUM_HEADS, lambda_decay=LAMBDA_DECAY)
    assert out.shape == (B, S, D)
    # bf16 MXU operands (f32 accumulation) -> loosened tolerance vs. the f32 reference.
    assert jnp.allclose(out, ref, atol=1e-2, rtol=1e-2), "Pallas output mismatch vs reference"

    print("KERNEL_OK")
</pallas_src>

<mosaic_0001>
module attributes {stable_mosaic.version = 11 : i64} {
  func.func @_mhla_head_kernel(%arg0: i32, %arg1: i32, %arg2: memref<1x8x32xbf16, #tpu.memory_space<vmem>>, %arg3: memref<1x32x8xbf16, #tpu.memory_space<vmem>>, %arg4: memref<32x16xbf16, #tpu.memory_space<vmem>>, %arg5: memref<1x16x8xbf16, #tpu.memory_space<vmem>>, %arg6: memref<1x16x8xbf16, #tpu.memory_space<vmem>>, %arg7: memref<1x8x32xbf16, #tpu.memory_space<vmem>>, %arg8: memref<1x8x32xf32, #tpu.memory_space<vmem>>, %arg9: memref<8x16xbf16, #tpu.memory_space<vmem>>) attributes {dimension_semantics = [#tpu.dimension_semantics<parallel>, #tpu.dimension_semantics<arbitrary>], iteration_bounds = array<i64: 2, 4>, scalar_prefetch = 0 : i64, scratch_operands = 1 : i64, tpu.core_type = #tpu.core_type<tc>, window_params = [{transform_indices = @transform_0, window_bounds = array<i64: 1, 8, 32>}, {transform_indices = @transform_1, window_bounds = array<i64: 1, 32, 8>}, {pipeline_mode = #tpu.pipeline_mode<synchronous>, transform_indices = @transform_2, window_bounds = array<i64: 32, 16>}, {transform_indices = @transform_3, window_bounds = array<i64: 1, 16, 8>}, {transform_indices = @transform_4, window_bounds = array<i64: 1, 16, 8>}, {transform_indices = @transform_5, window_bounds = array<i64: 1, 8, 32>}, {transform_indices = @transform_6, window_bounds = array<i64: 1, 8, 32>}]} {
    %c0 = arith.constant 0 : index
    %c0_0 = arith.constant 0 : index
    %c0_1 = arith.constant 0 : index
    %0 = vector.load %arg2[%c0, %c0_0, %c0_1] : memref<1x8x32xbf16, #tpu.memory_space<vmem>>, vector<1x8x32xbf16>
    %1 = vector.shape_cast %0 : vector<1x8x32xbf16> to vector<8x32xbf16>
    %c0_i32 = arith.constant 0 : i32
    %2 = arith.cmpi eq, %arg1, %c0_i32 : i32
    %3 = arith.extui %2 : i1 to i32
    %c0_i32_2 = arith.constant 0 : i32
    %4 = arith.cmpi ne, %3, %c0_i32_2 : i32
    scf.if %4 {
      %c0_31 = arith.constant 0 : index
      %c0_32 = arith.constant 0 : index
      %50 = vector.load %arg4[%c0_31, %c0_32] : memref<32x16xbf16, #tpu.memory_space<vmem>>, vector<32x16xbf16>
      %cst_33 = arith.constant dense<0.000000e+00> : vector<8x16xf32>
      %51 = tpu.matmul %1, %50, %cst_33 {dimension_numbers = #tpu.dot_dimension_numbers<[1], [0], [0], [1], [0, 0, 1, 1], [], []>} : vector<8x32xbf16>, vector<32x16xbf16>, vector<8x16xf32> -> vector<8x16xf32>
      %52 = arith.truncf %51 : vector<8x16xf32> to vector<8x16xbf16>
      %c0_34 = arith.constant 0 : index
      %c0_35 = arith.constant 0 : index
      %53 = vector.load %arg9[%c0_34, %c0_35] : memref<8x16xbf16, #tpu.memory_space<vmem>>, vector<8x16xbf16>
      tpu.vector_store %arg9[%c0_34, %c0_35], %52 {strides = array<i32>} : memref<8x16xbf16, #tpu.memory_space<vmem>>, vector<8x16xbf16>,
      %cst_36 = arith.constant 0.000000e+00 : f32
      %54 = vector.broadcast %cst_36 : f32 to vector<8x32xf32>
      %c0_37 = arith.constant 0 : index
      %c0_38 = arith.constant 0 : index
      %c0_39 = arith.constant 0 : index
      %55 = vector.load %arg8[%c0_37, %c0_38, %c0_39] : memref<1x8x32xf32, #tpu.memory_space<vmem>>, vector<1x8x32xf32>
      %56 = vector.shape_cast %55 : vector<1x8x32xf32> to vector<8x32xf32>
      %57 = vector.shape_cast %54 : vector<8x32xf32> to vector<1x8x32xf32>
      tpu.vector_store %arg8[%c0_37, %c0_38, %c0_39], %57 {strides = array<i32>} : memref<1x8x32xf32, #tpu.memory_space<vmem>>, vector<1x8x32xf32>,
    } else {
    }
    %c0_3 = arith.constant 0 : index
    %c0_4 = arith.constant 0 : index
    %5 = vector.load %arg9[%c0_3, %c0_4] : memref<8x16xbf16, #tpu.memory_space<vmem>>, vector<8x16xbf16>
    %c0_5 = arith.constant 0 : index
    %c0_6 = arith.constant 0 : index
    %c0_7 = arith.constant 0 : index
    %6 = vector.load %arg3[%c0_5, %c0_6, %c0_7] : memref<1x32x8xbf16, #tpu.memory_space<vmem>>, vector<1x32x8xbf16>
    %7 = vector.shape_cast %6 : vector<1x32x8xbf16> to vector<32x8xbf16>
    %cst = arith.constant dense<0.000000e+00> : vector<8x8xf32>
    %8 = tpu.matmul %1, %7, %cst {dimension_numbers = #tpu.dot_dimension_numbers<[1], [0], [0], [1], [0, 0, 1, 1], [], []>} : vector<8x32xbf16>, vector<32x8xbf16>, vector<8x8xf32> -> vector<8x8xf32>
    %c0_8 = arith.constant 0 : index
    %c0_9 = arith.constant 0 : index
    %c0_10 = arith.constant 0 : index
    %9 = vector.load %arg5[%c0_8, %c0_9, %c0_10] : memref<1x16x8xbf16, #tpu.memory_space<vmem>>, vector<1x16x8xbf16>
    %10 = vector.shape_cast %9 : vector<1x16x8xbf16> to vector<16x8xbf16>
    %cst_11 = arith.constant dense<0.000000e+00> : vector<8x8xf32>
    %11 = tpu.matmul %5, %10, %cst_11 {dimension_numbers = #tpu.dot_dimension_numbers<[1], [0], [0], [1], [0, 0, 1, 1], [], []>} : vector<8x16xbf16>, vector<16x8xbf16>, vector<8x8xf32> -> vector<8x8xf32>
    %c0_12 = arith.constant 0 : index
    %c0_13 = arith.constant 0 : index
    %c0_14 = arith.constant 0 : index
    %12 = vector.load %arg6[%c0_12, %c0_13, %c0_14] : memref<1x16x8xbf16, #tpu.memory_space<vmem>>, vector<1x16x8xbf16>
    %13 = vector.shape_cast %12 : vector<1x16x8xbf16> to vector<16x8xbf16>
    %cst_15 = arith.constant dense<0.000000e+00> : vector<8x8xf32>
    %14 = tpu.matmul %5, %13, %cst_15 {dimension_numbers = #tpu.dot_dimension_numbers<[1], [0], [0], [1], [0, 0, 1, 1], [], []>} : vector<8x16xbf16>, vector<16x8xbf16>, vector<8x8xf32> -> vector<8x8xf32>
    %15 = arith.truncf %8 : vector<8x8xf32> to vector<8x8xbf16>
    %16 = arith.truncf %11 : vector<8x8xf32> to vector<8x8xbf16>
    %cst_16 = arith.constant dense<0.000000e+00> : vector<8x8xf32>
    %17 = tpu.matmul %15, %16, %cst_16 {dimension_numbers = #tpu.dot_dimension_numbers<[1], [1], [0], [0], [0, 0, 1, 0], [], []>} : vector<8x8xbf16>, vector<8x8xbf16>, vector<8x8xf32> -> vector<8x8xf32>
    %18 = tpu.iota {dimensions = array<i32: 0>} : vector<8x8xi32>
    %19 = tpu.iota {dimensions = array<i32: 1>} : vector<8x8xi32>
    %20 = arith.subi %18, %19 : vector<8x8xi32>
    %21 = math.absi %20 : vector<8x8xi32>
    %22 = arith.sitofp %21 : vector<8x8xi32> to vector<8x8xf32>
    %cst_17 = arith.constant -0.00999999977 : f32
    %23 = vector.broadcast %cst_17 : f32 to vector<8x8xf32>
    %24 = arith.mulf %22, %23 : vector<8x8xf32>
    %25 = math.exp %24 : vector<8x8xf32>
    %26 = arith.mulf %17, %25 : vector<8x8xf32>
    %cst_18 = arith.constant dense<0xFF800000> : vector<8xf32>
    %27 = vector.multi_reduction <maximumf>, %26, %cst_18 [1] : vector<8x8xf32> to vector<8xf32>
    %28 = vector.shape_cast %27 : vector<8xf32> to vector<8x1xf32>
    %29 = vector.broadcast %28 : vector<8x1xf32> to vector<8x8xf32>
    %30 = arith.subf %26, %29 : vector<8x8xf32>
    %31 = math.exp %30 : vector<8x8xf32>
    %cst_19 = arith.constant dense<0.000000e+00> : vector<8xf32>
    %32 = vector.multi_reduction <add>, %31, %cst_19 [1] : vector<8x8xf32> to vector<8xf32>
    %33 = vector.shape_cast %32 : vector<8xf32> to vector<8x1xf32>
    %34 = tpu.reciprocal %33 {approx = true} : vector<8x1xf32> -> vector<8x1xf32>
    %35 = vector.broadcast %34 : vector<8x1xf32> to vector<8x8xf32>
    %36 = arith.mulf %31, %35 : vector<8x8xf32>
    %37 = arith.truncf %36 : vector<8x8xf32> to vector<8x8xbf16>
    %38 = arith.truncf %14 : vector<8x8xf32> to vector<8x8xbf16>
    %cst_20 = arith.constant dense<0.000000e+00> : vector<8x8xf32>
    %39 = tpu.matmul %37, %38, %cst_20 {dimension_numbers = #tpu.dot_dimension_numbers<[1], [0], [0], [1], [0, 0, 1, 1], [], []>} : vector<8x8xbf16>, vector<8x8xbf16>, vector<8x8xf32> -> vector<8x8xf32>
    %c0_21 = arith.constant 0 : index
    %c0_22 = arith.constant 0 : index
    %c0_23 = arith.constant 0 : index
    %40 = vector.load %arg8[%c0_21, %c0_22, %c0_23] : memref<1x8x32xf32, #tpu.memory_space<vmem>>, vector<1x8x32xf32>
    %41 = vector.shape_cast %40 : vector<1x8x32xf32> to vector<8x32xf32>
    %42 = arith.truncf %39 : vector<8x8xf32> to vector<8x8xbf16>
    %c0_24 = arith.constant 0 : index
    %c0_25 = arith.constant 0 : index
    %c0_26 = arith.constant 0 : index
    %43 = vector.load %arg7[%c0_24, %c0_25, %c0_26] : memref<1x8x32xbf16, #tpu.memory_space<vmem>>, vector<1x8x32xbf16>
    %44 = vector.shape_cast %43 : vector<1x8x32xbf16> to vector<8x32xbf16>
    %cst_27 = arith.constant dense<0.000000e+00> : vector<8x32xf32>
    %45 = tpu.matmul %42, %44, %cst_27 {dimension_numbers = #tpu.dot_dimension_numbers<[1], [0], [0], [1], [0, 0, 1, 1], [], []>} : vector<8x8xbf16>, vector<8x32xbf16>, vector<8x32xf32> -> vector<8x32xf32>
    %46 = arith.addf %41, %45 : vector<8x32xf32>
    %c0_28 = arith.constant 0 : index
    %c0_29 = arith.constant 0 : index
    %c0_30 = arith.constant 0 : index
    %47 = vector.load %arg8[%c0_28, %c0_29, %c0_30] : memref<1x8x32xf32, #tpu.memory_space<vmem>>, vector<1x8x32xf32>
    %48 = vector.shape_cast %47 : vector<1x8x32xf32> to vector<8x32xf32>
    %49 = vector.shape_cast %46 : vector<8x32xf32> to vector<1x8x32xf32>
    tpu.vector_store %arg8[%c0_28, %c0_29, %c0_30], %49 {strides = array<i32>} : memref<1x8x32xf32, #tpu.memory_space<vmem>>, vector<1x8x32xf32>,
    return
  }
  func.func @transform_0(%arg0: i32, %arg1: i32) -> (i32, i32, i32) {
    %c0_i32 = arith.constant 0 : i32
    %c0_i32_0 = arith.constant 0 : i32
    %c0_i32_1 = arith.constant 0 : i32
    return %arg0, %c0_i32, %c0_i32_0 : i32, i32, i32
  }
  func.func @transform_1(%arg0: i32, %arg1: i32) -> (i32, i32, i32) {
    %c0_i32 = arith.constant 0 : i32
    %c0_i32_0 = arith.constant 0 : i32
    %c0_i32_1 = arith.constant 0 : i32
    return %arg1, %c0_i32, %c0_i32_0 : i32, i32, i32
  }
  func.func @transform_2(%arg0: i32, %arg1: i32) -> (i32, i32) {
    %c0_i32 = arith.constant 0 : i32
    %c0_i32_0 = arith.constant 0 : i32
    %c0_i32_1 = arith.constant 0 : i32
    return %c0_i32, %c0_i32_0 : i32, i32
  }
  func.func @transform_3(%arg0: i32, %arg1: i32) -> (i32, i32, i32) {
    %c0_i32 = arith.constant 0 : i32
    %c0_i32_0 = arith.constant 0 : i32
    %c0_i32_1 = arith.constant 0 : i32
    return %arg1, %c0_i32, %c0_i32_0 : i32, i32, i32
  }
  func.func @transform_4(%arg0: i32, %arg1: i32) -> (i32, i32, i32) {
    %c0_i32 = arith.constant 0 : i32
    %c0_i32_0 = arith.constant 0 : i32
    %c0_i32_1 = arith.constant 0 : i32
    return %arg1, %c0_i32, %c0_i32_0 : i32, i32, i32
  }
  func.func @transform_5(%arg0: i32, %arg1: i32) -> (i32, i32, i32) {
    %c0_i32 = arith.constant 0 : i32
    %c0_i32_0 = arith.constant 0 : i32
    %c0_i32_1 = arith.constant 0 : i32
    return %arg1, %c0_i32, %c0_i32_0 : i32, i32, i32
  }
  func.func @transform_6(%arg0: i32, %arg1: i32) -> (i32, i32, i32) {
    %c0_i32 = arith.constant 0 : i32
    %c0_i32_0 = arith.constant 0 : i32
    %c0_i32_1 = arith.constant 0 : i32
    return %arg0, %c0_i32, %c0_i32_0 : i32, i32, i32
  }
}

</mosaic_0001>

<bundles_post_ra>
// kernel: tpu_custom_call.1
= control target key start
LH: loop header
LB: loop body
LE: loop exit
PB: predicated region body
PF: predicated region fallthrough
CT: control target
= control target key end

     0   :  { %11 = vsyncpa [#allocation4], 0  ;;  %s1382_s0 = inlined_call_operand.vmem [shape: bf16[2,8,32], index: 0, kind: input, shape index: {}]   ;;  %s1383_s1 = inlined_call_operand.vmem [shape: bf16[4,32,8], index: 1, kind: input, shape index: {}]   ;;  %s1384_s2 = inlined_call_operand.vmem [shape: bf16[32,16], index: 2, kind: input, shape index: {}]   ;;  %s1385_s3 = inlined_call_operand.vmem [shape: bf16[4,16,8], index: 3, kind: input, shape index: {}]   ;;  %s1386_s4 = inlined_call_operand.vmem [shape: bf16[4,16,8], index: 4, kind: input, shape index: {}]   ;;  %s1387_s5 = inlined_call_operand.vmem [shape: bf16[4,8,32], index: 5, kind: input, shape index: {}]   ;;  %s1388_s6 = inlined_call_operand.hbm [shape: f32[2,8,32], index: 6, kind: output, shape index: {}]  }
   0x1   :  { %13 = vsyncpa [#allocation4 + $0x1], 0  ;;  %s1193_s21 = smov 0   ;;  %s1195_s22 = smov 0  }
   0x2   :  { %s1197_s23 = smov 0   ;;  %s1199_s24 = smov 0  }
   0x3   :  { %s1201_s25 = smov 0   ;;  %s1203_s26 = smov 0  }
   0x4   :  { %s1205_s27 = smov 0   ;;  %s1207_s28 = smov 0  }
   0x5 LB: > { %1395 = sst [smem:[#allocation6_spill]] %s1131_s23  ;;  %s872_s29 = sadd.s32 4294967295, %s1151_s28   ;;  %s1151_s28 = sphi %s1207_s28, %s19_s28   ;;  %s1147_s27 = sphi %s1205_s27, %s1411_s27   ;;  %s1143_s26 = sphi %s1203_s26, %s1410_s26   ;;  %s1139_s25 = sphi %s1201_s25, %s1409_s25   ;;  %s1135_s24 = sphi %s1199_s24, %s1414_s24   ;;  %s1131_s23 = sphi %s1197_s23, %s1407_s23   ;;  %s1127_s22 = sphi %s1195_s22, %s1413_s22   ;;  %s1123_s21 = sphi %s1193_s21, %s1412_s21  }
   0x6   : > { %1396 = sst [smem:[#allocation7_spill]] %s1143_s26  ;;  %s873_s30 = sadd.s32 4294967294, %s1151_s28  }
   0x7   : > { %1397 = sst [smem:[#allocation8_spill]] %s1147_s27  ;;  %s28_s7 = sadd.s32 1, %s1143_s26 }
   0x8   : > { %p29_p0 = scmp.ge.s32.totalorder %s28_s7, 4  ;;  %s31_s8 = sadd.s32 1, %s1147_s27 }
   0x9   : > { %p199_p1 = scmp.ne.s32.totalorder %s1131_s23, %s1127_s22  ;;  %p200_p2 = scmp.eq.s32.totalorder %s872_s29, 7 }
   0xa   : > { %s1416_s7 = smov (%p29_p0, %s28_s7), 0  ;;  %s1418_s8 = smov (!%p29_p0, %s31_s8), %s1147_s27 }
   0xb   : > { %1398 = sst [smem:[#allocation9_spill]] %s1416_s7  ;;  %p1242_p3 = por %p200_p2, %p199_p1 }
   0xc   : > { %p205_p4 = scmp.ne.s32.totalorder %s1127_s22, %s1123_s21  ;;  %p33_p5 = scmp.ge.s32.totalorder %s1418_s8, 2 }
   0xd   : > { %p206_p6 = scmp.eq.s32.totalorder %s873_s30, 7  ;;  %p876_p7 = scmp.ge.s32.totalorder %s1151_s28, 1 }
   0xe   : > { %p265_p8 = scmp.lt.s32.totalorder %s1151_s28, 9  ;;  %s1420_s8 = smov (%p33_p5, %s1418_s8), 0 }
   0xf   : > { %1400 = sst [smem:[#allocation10_spill]] %s1420_s8  ;;  %p1252_p9 = por %p206_p6, %p205_p4 }
  0x10   : > { %p266_p10 = pnand %p876_p7, %p265_p8  ;;  %s186_s11 = ssub.s32 %s1147_s27, %s1420_s8 }
  0x11   : > { %s1401_s10 = scalar_select %p1252_p9, 1, 0 }
  0x12   : > { %s189_s12 = sadd.s32 1, %s1131_s23  ;;  %p187_p11 = scmp.eq.s32.totalorder %s186_s11, 0 }
  0x13   : > { %1402 = sst [smem:[#allocation11_spill]] %s1401_s10  ;;  %269 = sbr.rel (%p266_p10) target bundleno = 1453 (0x5ad), region = 44 }
  0x14   : > { %s1260_s13 = scalar_select %p187_p11, %s1131_s23, %s189_s12  }
  0x15   : > { %s1392_s14 = sand.u32 (!%p266_p10), 1, %s1127_s22   ;;  %p313_p12 = scmp.lt.s32.totalorder (!%p266_p10), %s1139_s25, 1 }
  0x16   : > { %1403 = sst [smem:[#allocation12_spill]] %s1260_s13  ;;  %s877_s15 = sshll.u32 (!%p266_p10), %s1392_s14, 3 }
  0x17   : > { %p317_p13 = scmp.lt.s32.totalorder (!%p266_p10), %s1135_s24, 3  ;;  %s1290_s11 = scalar_lea.vmem (!%p266_p10), [#allocation3], %s877_s15 }
  0x18   : > { %p886_p0 = scmp.ne.s32.totalorder (!%p266_p10), %s1135_s24, 0 }
  0x1a   : > { %s314_s16 = scalar_select %p313_p12, %s1139_s25, 1 }
  0x1b   : > { %s318_s17 = scalar_select %p317_p13, %s1135_s24, 3 }
  0x1c   : > { %s878_s18 = sshll.u32 %s314_s16, 2  ;;  %341 = sbr.rel (%p886_p0) target bundleno = 252 (0xfc), region = 48  ;;  %v1045_v1 = vld [vmem:[%s1384_s2] sm:$0xff] (!%p886_p0)   ;;  %v1153_v2 = vmov (!%p886_p0), 0.0   ;;  %v1046_v3 = vld [vmem:[%s1384_s2 + $0x8] sm:$0xff] (!%p886_p0)   ;;  %vm1154_vm0 = vmmov (!%p886_p0), 0  }
  0x1d   : > { %s316_s29 = scalar_lea.vmem %s1382_s0, %s878_s18  ;;  %s905_s30 = sshll.u32 %s318_s17, 4  ;;  %924 = vmatprep.subr.bf16.mxu0 (!%p886_p0), %v1153_v2  ;;  %928 = vmatprep.mubr.msk.bf16.mxu0 (!%p886_p0), %vm1154_vm0, %v1153_v2  ;;  %vm358_vm1 = vcmask (!%p886_p0), 261120   ;;  %vm403_vm2 = vcmask (!%p886_p0), 125952  }
  0x1e   : > { %s1275_s8 = scalar_lea.vmem %s1383_s1, %s905_s30  ;;  %s906_s7 = sshll.u32 %s318_s17, 3  ;;  %v337_v0 = vld [vmem:[%s316_s29] sm:$0xf]  ;;  %925 = vmatpush3.bf16.msra.mxu0 (!%p886_p0), %v1045_v1  ;;  %405 = vst.msk [vmem:[%s1290_s11] sm:$0xff] (!%p886_p0), %vm358_vm1, %v1153_v2 }
  0x1f   : > { %s326_s14 = scalar_lea.vmem %s1385_s3, %s906_s7  ;;  %s1283_s16 = scalar_lea.vmem %s1386_s4, %s906_s7  ;;  %926 = vmatprep.subr.bf16.mxu0 (!%p886_p0), %v1153_v2 }
  0x20   : > { %s885_s10 = sshll.u32 %s318_s17, 2 }
  0x21   : > { %s1288_s20 = scalar_lea.vmem %s1387_s5, %s885_s10 }
  0x22   : > { %927 = vmatpush3.bf16.msra.mxu0 (!%p886_p0), %v1046_v3 }
  0x25   : > { %929 = vmatmul.mubr.msk.bf16.vlgmr.msra.gmra.mrb[0].mxu0 %vm358_vm1, %v337_v0 }
  0xf8   : > { %v396_v4 = vpop.f32.mrb[0].mxu0 }
  0xf9   : > { %v402_v5 = vpack.c.bf16 %v396_v4, %v396_v4  ;;  %v930_v6 = vpop.f32.mrb[1].mxu0 }
  0xfa   : > { %v399_v7 = vpop.f32.mrb[2].mxu0 }
  0xfb   : > { %404 = vst.msk [vmem:[#allocation2] sm:$0xf] %vm403_vm2, %v402_v5  ;;  %v931_v8 = vpop.f32.mrb[3].mxu0 }
  0xfc PF: > { %v1047_v9 = vld [vmem:[%s326_s14] sm:$0xff]   ;;  %v1155_v10 = vmov 0.0   ;;  %vm1156_vm3 = vmmov 0   ;;  %vm475_vm4 = vcmask 130048   ;;  %v1049_v13 = vld [vmem:[%s1275_s8 + $0x8] sm:$0xff]   ;;  %vm423_vm5 = vcmask 261120  }
  0xfd   : > { %940 = vmatprep.subr.bf16.mxu1 %v1155_v10  ;;  %932 = vmatprep.subr.bf16.mxu0 %v1155_v10  ;;  %v1048_v11 = vld [vmem:[%s1275_s8] sm:$0xff]   ;;  %vm569_vm6 = vcmask 64512   ;;  %v616_v26 = vlaneseq  ;;  %vm645_vm7 = vcmask 1043456   ;;  %s902_s24 = sshll.u32 %s1139_s25, 7  ;;  %s754_s27 = sshll.u32 %s1290_s11, 4  ;;  %s1327_s27 = int_to_ptr.vmem [resolvable:$true] %s754_s27 }
  0xfe   : > { %941 = vmatpush3.bf16.msra.mxu1 %v1047_v9  ;;  %942 = vmatprep.mubr.msk.bf16.mxu1 %vm1156_vm3, %v1155_v10  ;;  %v1050_v25 = vld [vmem:[%s1283_s16] sm:$0xff]   ;;  %s1325_s10 = scalar_lea.hbm %s1388_s6, %s902_s24  ;;  %s1404_s13 = sand.u32 1, %s1127_s22  }
  0xff   : > { %933 = vmatpush3.bf16.msra.mxu0 %v1048_v11  ;;  %936 = vmatprep.mubr.msk.bf16.mxu0 %vm1156_vm3, %v1155_v10  ;;  %v617_v27 = vshrl.u32 %v616_v26, 7  ;;  %v619_v28 = vand.u32 127, %v616_v26  ;;  %v691_v53 = vld [vmem:[%s1288_s20] sm:$0xf]  ;;  %s741_s25 = scalar_lea.sflag [#allocation4], %s1404_s13  ;;  %s1057_s14 = scalar_lea.vmem %s1327_s27, 128 }
 0x100   : > { %934 = vmatprep.subr.bf16.mxu0 %v1155_v10  ;;  %946 = vmatprep.subr.bf16.mxu1 %v1155_v10  ;;  %v696_v54 = vsel %vm645_vm7, %v691_v53, 0  ;;  %p1058_p1 = scmp.ne.s32.totalorder %s1327_s27, %s1057_s14  ;;  %s1157_s15 = smov [#allocation3]  }
 0x101   : > { %v620_v29 = vsub.s32 %v617_v27, %v619_v28  ;;  %s1061_s17 = sshll.u32 %s1157_s15, 4  ;;  %s1062_s17 = int_to_ptr.vmem [resolvable:$false] %s1061_s17 }
 0x102   : > { %v406_v12 = vld [vmem:[#allocation2] sm:$0xf]  ;;  %p1059_p2 = pnand %p1058_p1, %p1242_p3  ;;  %s1063_s12 = scalar_lea.vmem %s1062_s17, 256 }
 0x103   : > { %943 = vmatmul.mubr.msk.bf16.vlgmr.msra.gmra.mrb[0].mxu1 %vm475_vm4, %v406_v12  ;;  %935 = vmatpush3.bf16.msra.mxu0 %v1049_v13  ;;  %v622_v30 = vsub.s32 0, %v620_v29  ;;  %p1064_p5 = scmp.lt.s32.totalorder %s1327_s27, %s1062_s17  ;;  %p1065_p6 = scmp.lt.s32.totalorder %s1063_s12, %s1057_s14 }
 0x104   : > { %948 = vmatprep.mubr.msk.bf16.mxu1 %vm1156_vm3, %v1155_v10  ;;  %952 = vmatprep.subr.bf16.mxu0 %v1155_v10  ;;  %p1060_p4 = pneg %p1059_p2 }
 0x105   : > { %947 = vmatpush3.bf16.msra.mxu1 %v1050_v25  ;;  %v898_v31 = vmin.u32 %v622_v30, %v620_v29  ;;  %p1066_p7 = por %p1065_p6, %p1064_p5 }
 0x106   : > { %937 = vmatmul.mubr.msk.bf16.vlgmr.msra.gmra.mrb[0].mxu0 %vm423_vm5, %v337_v0  ;;  %958 = vmatprep.subr.bf16.mxu1 %v1155_v10  ;;  %v689_v0 = vld [vmem:[%s1290_s11] sm:$0xff] }
 0x107   : > { %954 = vmatprep.mubr.msk.bf16.mxu0 %vm1156_vm3, %v1155_v10  ;;  %v624_v32 = vcvt.s32.f32 %v898_v31  ;;  %p1067_p8 = pnand %p1066_p7, %p1060_p4 }
 0x109   : > { %v625_v33 = vmul.f32 -0.01, %v624_v32 }
 0x10b   : > { %949 = vmatmul.mubr.msk.bf16.vlgmr.msra.gmra.mrb[4].mxu1 %vm475_vm4, %v406_v12  ;;  %v626_v34 = vmul.f32 1.442695, %v625_v33 }
 0x10c   : > { %960 = vmatprep.mubr.msk.bf16.mxu1 %vm1156_vm3, %v1155_v10 }
 0x10d   : > { %1051 = vpow2.f32 %v626_v34 }
 0x117   : > { %v1052_v35 = vpop.eup %1051 }
 0x1d6   : > { %v513_v14 = vpop.f32.mrb[0].mxu1 }
 0x1d7   : > { %v568_v15 = vpack.c.bf16 %v513_v14, %v513_v14  ;;  %v944_v16 = vpop.f32.mrb[1].mxu1 }
 0x1d8   : > { %v516_v17 = vpop.f32.mrb[2].mxu1 }
 0x1d9   : > { %v574_v18 = vsel %vm569_vm6, %v568_v15, 0  ;;  %v945_v19 = vpop.f32.mrb[3].mxu1  ;;  %v461_v20 = vpop.f32.mrb[0].mxu0 }
 0x1da   : > { %953 = vmatpush3.bf16.xpose.msra.mxu0 %v574_v18  ;;  %v938_v21 = vpop.f32.mrb[1].mxu0  ;;  %v567_v22 = vpack.c.bf16 %v461_v20, %v461_v20 }
 0x1db   : > { %964 = vmatprep.subr.bf16.mxu0 %v1155_v10  ;;  %v464_v23 = vpop.f32.mrb[2].mxu0 }
 0x1dc   : > { %v939_v24 = vpop.f32.mrb[3].mxu0 }
 0x1de   : > { %v561_v47 = vpop.f32.mrb[4].mxu1 }
 0x1df   : > { %v950_v48 = vpop.f32.mrb[5].mxu1  ;;  %v641_v51 = vpack.c.bf16 %v561_v47, %v561_v47 }
 0x1e0   : > { %v564_v49 = vpop.f32.mrb[6].mxu1 }
 0x1e1   : > { %955 = vmatmul.mubr.msk.bf16.vlgmr.msra.gmra.mrb[4].mxu0 %vm569_vm6, %v567_v22  ;;  %v951_v50 = vpop.f32.mrb[7].mxu1  ;;  %v647_v52 = vsel %vm645_vm7, %v641_v51, 0 }
 0x1e2   : > { %966 = vmatprep.mubr.msk.bf16.mxu0 %vm1156_vm3, %v1155_v10  ;;  %959 = vmatpush3.bf16.msra.mxu1 %v647_v52 }
 0x1e3   : > { %965 = vmatpush3.bf16.msra.mxu0 %v696_v54 }
 0x2b4   : > { %v610_v36 = vpop.f32.mrb[4].mxu0 }
 0x2b5   : > { %v628_v37 = vmul.f32 %v1052_v35, %v610_v36  ;;  %v956_v38 = vpop.f32.mrb[5].mxu0 }
 0x2b6   : > { %v613_v39 = vpop.f32.mrb[6].mxu0 }
 0x2b7   : > { %v957_v40 = vpop.f32.mrb[7].mxu0  ;;  %v629_v41 = vsel %vm569_vm6, %v628_v37, -inf }
 0x2b8   : > { %630 = vmax.xlane.f32.xlu0 %v629_v41 }
 0x345   : > { %v631_v42 = vpop.xlane.xlu0 %630 }
 0x346   : > { %v632_v43 = vsub.f32 %v628_v37, %v631_v42 }
 0x348   : > { %v633_v44 = vmul.f32 1.442695, %v632_v43 }
 0x34a   : > { %1053 = vpow2.f32 %v633_v44 }
 0x354   : > { %v1054_v45 = vpop.eup %1053 }
 0x355   : > { %v635_v46 = vsel %vm569_vm6, %v1054_v45, 0.0 }
 0x356   : > { %636 = vadd.xlane.f32.xlu0 %v635_v46 }
 0x3e3   : > { %v637_v55 = vpop.xlane.xlu0 %636 }
 0x3e4   : > { %1055 = vrcp.f32 %v637_v55 }
 0x3ee   : > { %v1056_v56 = vpop.eup %1055 }
 0x3ef   : > { %v639_v57 = vmul.f32 %v1056_v56, %v1054_v45 }
 0x3f1   : > { %v640_v58 = vpack.c.bf16 %v639_v57, %v639_v57 }
 0x3f3   : > { %961 = vmatmul.mubr.msk.bf16.vlgmr.msra.gmra.mrb[8].mxu1 %vm569_vm6, %v640_v58 }
 0x4c6   : > { %v683_v59 = vpop.f32.mrb[8].mxu1 }
 0x4c7   : > { %v690_v60 = vpack.c.bf16 %v683_v59, %v683_v59  ;;  %v962_v61 = vpop.f32.mrb[9].mxu1 }
 0x4c8   : > { %v686_v62 = vpop.f32.mrb[10].mxu1 }
 0x4c9   : > { %v963_v63 = vpop.f32.mrb[11].mxu1  ;;  %967 = vmatmul.mubr.msk.bf16.vlgmr.msra.gmra.mrb[8].mxu0 %vm569_vm6, %v690_v60 }
 0x59c   : > { %v732_v1 = vpop.f32.mrb[8].mxu0 }
 0x59d   : > { %v738_v2 = vadd.f32 %v732_v1, %v689_v0  ;;  %v968_v3 = vpop.f32.mrb[9].mxu0 }
 0x59e   : > { %v735_v4 = vpop.f32.mrb[10].mxu0 }
 0x59f   : > { %739 = vst.msk [vmem:[%s1290_s11] sm:$0xff] %vm423_vm5, %v738_v2  ;;  %v969_v5 = vpop.f32.mrb[11].mxu0 }
 0x5a0   : > { %1070 = shalt.err (!%p1067_p8)
}
 0x5a1   : > { %s1071_s16 = scalar_lea.hbm %s1325_s10, 128  ;;  %s1075_s20 = scalar_lea.hbm %s1388_s6, 256 }
 0x5a2   : > { %p1072_p10 = scmp.ne.s32.totalorder %s1325_s10, %s1071_s16  ;;  %p1076_p13 = scmp.lt.u32.totalorder %s1325_s10, %s1388_s6 }
 0x5a3   : > { %p1077_p0 = scmp.lt.u32.totalorder %s1075_s20, %s1071_s16  ;;  %p1079_p2 = scmp.lt.u32.totalorder %s1071_s16, %s1325_s10 }
 0x5a4   : > { %p1073_p11 = pnand %p1072_p10, %p1242_p3 }
 0x5a5   : > { %p1078_p1 = por %p1077_p0, %p1076_p13 }
 0x5a6   : > { %p1074_p12 = pneg %p1073_p11 }
 0x5a7   : > { %p1080_p4 = por %p1079_p2, %p1078_p1 }
 0x5a9   : > { %p1081_p5 = pnand %p1080_p4, %p1074_p12 }
 0x5ab   : > { %1084 = shalt.err (!%p1081_p5)
}
 0x5ac   : > { %970 = dma.vmem_to_hbm [thread:$0]  (%p1242_p3), %s1327_s27, 128, %s1325_s10, %s741_s25  }
 0x5ad PF: > { %p976_p6 = scmp.ge.s32.totalorder %s1151_s28, 2  ;;  %s766_s23 = sand.u32 1, %s1123_s21  }
 0x5ae   : > { %s767_s26 = scalar_lea.sflag [#allocation4], %s766_s23 }
 0x5af   : > { %p973_p7 = pnand %p976_p6, %p1252_p9 }
 0x5b1   : > { %1118 = dma.done.wait (!%p973_p7), %s767_s26, 128  }
 0x5b2   : > { %1120 = vsyncadd (!%p973_p7), %s767_s26, 4294967168  ;;  %s19_s28 = sadd.s32 1, %s1151_s28   ;;  %s1406_s24 = sld [smem:[#allocation6_spill]] }
 0x5b3   : > { %p16_p8 = scmp.ge.s32.totalorder %s19_s28, 10   ;;  %s1407_s23 = sld [smem:[#allocation12_spill]] }
 0x5b4   : > { %s1408_s9 = sld [smem:[#allocation7_spill]]  ;;  %s1409_s25 = sld [smem:[#allocation8_spill]] }
 0x5b5   : > { %s1410_s26 = sld [smem:[#allocation9_spill]]  ;;  %s1411_s27 = sld [smem:[#allocation10_spill]] }
 0x5b6   : > { %s1412_s21 = smov %s1127_s22  ;;  %18 = sbr.rel (!%p16_p8) target bundleno = 5 (0x5), region = 95 }
 0x5b8   : > { %s1413_s22 = smov %s1406_s24 }
 0x5ba   : > { %s1414_s24 = smov %s1408_s9 }
 0x5bd   :  { %772 = vsyncpa [#allocation4], 1 }
 0x5be   :  { %774 = vsyncpa [#allocation4 + $0x1], 1 }

</bundles_post_ra>
